<compile_context>
chip_gen: v7x
topology: tpu7x:2x2x1
jax: 0.10.0
libtpu: 0.0.40
codegen_flags: <defaults>
</compile_context>

<pallas_src>
import functools

import jax
import jax.numpy as jnp
from jax import lax
from jax.experimental import pallas as pl
from jax.experimental.pallas import tpu as pltpu

HIDDEN = 128                      # fixed by the module (nn.Linear(in_shape, 128))
IN_PAD = 8                        # fc1 contraction padding (in_shape must fit)
LANE_PAD = 128                    # action-logit lane padding (== HIDDEN)
SUBLANE = 8
W_ROWS = IN_PAD + HIDDEN + SUBLANE  # 144: [w1 | w2 | biases] packed rows
MAX_TILE_B = 1024                 # batch tile: safe for v5e/v6e/v7x VMEM


def _policy_kernel(x_ref, w_ref, o_ref, *, out_dim):
    # Single packed weight buffer; static sublane-aligned views are free.
    w1 = w_ref[0:IN_PAD, :]                              # (8, 128)   bf16
    w2 = w_ref[IN_PAD:IN_PAD + HIDDEN, :]                # (128, 128) bf16
    bias = w_ref[IN_PAD + HIDDEN:W_ROWS, :].astype(jnp.float32)  # (8, 128)
    b1 = bias[0:1, :]
    b2 = bias[1:2, :]

    # fc1 + bias (VPU) + ReLU.  bf16 operands, f32 accumulation.
    h = jnp.dot(x_ref[...], w1, preferred_element_type=jnp.float32) + b1
    h = jnp.maximum(h, 0.0)

    # fc2 + bias.
    logits = jnp.dot(h.astype(jnp.bfloat16), w2,
                     preferred_element_type=jnp.float32) + b2

    # Mask padded action lanes, softmax over the action axis.
    col = lax.broadcasted_iota(jnp.int32, logits.shape, 1)
    logits = jnp.where(col < out_dim, logits, -1e30)
    m = jnp.max(logits, axis=-1, keepdims=True)
    e = jnp.exp(logits - m)
    s = jnp.sum(e, axis=-1, keepdims=True)
    o_ref[...] = (e * pl.reciprocal(s, approx=True)).astype(o_ref.dtype)


def prepare_params(w1, b1, w2, b2):
    """One-time packing of the Policy weights into a single bf16 TPU tile.

    Call once per parameter update; reuse the result for every forward().
      w1: (HIDDEN, in_shape)   b1: (HIDDEN,)
      w2: (out_shape, HIDDEN)  b2: (out_shape,)
    Layout of the packed (144, 128) buffer:
      rows [0, 8)    : W1^T, zero padded        (contracted with x)
      rows [8, 136)  : W2^T, zero padded lanes  (contracted with h)
      row  136       : b1
      row  137       : b2 (zero padded lanes)
    """
    in_shape = w1.shape[1]
    out_shape = w2.shape[0]
    assert in_shape <= IN_PAD, f"in_shape must be <= {IN_PAD}"
    assert out_shape <= LANE_PAD, f"out_shape must be <= {LANE_PAD}"
    assert w1.shape[0] == HIDDEN and w2.shape[1] == HIDDEN

    packed = jnp.zeros((W_ROWS, LANE_PAD), jnp.float32)
    packed = packed.at[:in_shape, :].set(w1.T.astype(jnp.float32))
    packed = packed.at[IN_PAD:IN_PAD + HIDDEN, :out_shape].set(
        w2.T.astype(jnp.float32))
    packed = packed.at[IN_PAD + HIDDEN, :].set(b1.astype(jnp.float32))
    packed = packed.at[IN_PAD + HIDDEN + 1, :out_shape].set(
        b2.astype(jnp.float32))
    packed = packed.astype(jnp.bfloat16)
    return packed, in_shape, out_shape


@functools.partial(jax.jit, static_argnames=("out_shape",))
def _policy_forward_packed(x2d, w_packed, *, out_shape):
    """Returns lane-dense probabilities, rows trimmed to the real batch."""
    b, in_shape = x2d.shape

    # Batch tiling (shapes are static under jit, so this is trace-time logic).
    if b <= MAX_TILE_B:
        tile_b = max(SUBLANE, ((b + SUBLANE - 1) // SUBLANE) * SUBLANE)
    else:
        tile_b = MAX_TILE_B
    b_pad = ((b + tile_b - 1) // tile_b) * tile_b
    grid = (b_pad // tile_b,)

    # Per-call glue: one pad (rows to b_pad, features to IN_PAD), cast to bf16.
    x_pad = jnp.pad(x2d.astype(jnp.bfloat16),
                    ((0, b_pad - b), (0, IN_PAD - in_shape)))

    out = pl.pallas_call(
        functools.partial(_policy_kernel, out_dim=out_shape),
        out_shape=jax.ShapeDtypeStruct((b_pad, LANE_PAD), jnp.float32),
        grid=grid,
        in_specs=[
            pl.BlockSpec((tile_b, IN_PAD), lambda i: (i, 0)),
            pl.BlockSpec((W_ROWS, LANE_PAD), lambda i: (0, 0)),
        ],
        out_specs=pl.BlockSpec((tile_b, LANE_PAD), lambda i: (i, 0)),
        compiler_params=pltpu.CompilerParams(
            dimension_semantics=("parallel",),
            vmem_limit_bytes=32 * 1024 * 1024,
        ),
    )(x_pad, w_packed)

    # Slice only rows here; keep the 128-lane-dense layout for downstream use.
    return out[:b]


def policy_forward(x, packed, trim=True):
    """x: (in_shape,) or (B, in_shape). Returns per-state action probabilities.

    trim=True  -> (out_shape,) / (B, out_shape)  (matches the PyTorch module)
    trim=False -> lane-dense (128,) / (B, 128) padded block (for a fused
                  sampler that indexes the first out_shape lanes itself).
    """
    w_packed, in_shape, out_shape = packed
    x2d = x[None, :] if x.ndim == 1 else x
    assert x2d.shape[-1] == in_shape
    probs = _policy_forward_packed(x2d, w_packed, out_shape=out_shape)
    if trim:
        probs = probs[:, :out_shape]
    return probs[0] if x.ndim == 1 else probs


def init_params(key, in_shape, out_shape):
    """nn.Linear default init: U(-1/sqrt(fan_in), 1/sqrt(fan_in))."""
    k1, k2, k3, k4 = jax.random.split(key, 4)
    bound1 = 1.0 / jnp.sqrt(in_shape)
    bound2 = 1.0 / jnp.sqrt(HIDDEN)
    w1 = jax.random.uniform(k1, (HIDDEN, in_shape), jnp.float32, -bound1, bound1)
    b1 = jax.random.uniform(k2, (HIDDEN,), jnp.float32, -bound1, bound1)
    w2 = jax.random.uniform(k3, (out_shape, HIDDEN), jnp.float32, -bound2, bound2)
    b2 = jax.random.uniform(k4, (out_shape,), jnp.float32, -bound2, bound2)
    return w1, b1, w2, b2


if __name__ == "__main__":
    in_shape, out_shape = 4, 2  # CartPole-style state/action dims

    key = jax.random.PRNGKey(0)
    kp, kx, kb, kr = jax.random.split(key, 4)
    w1, b1, w2, b2 = init_params(kp, in_shape, out_shape)
    packed = prepare_params(w1, b1, w2, b2)  # cached once per parameter update

    def ref_forward(xs):
        h = jnp.maximum(xs @ w1.T + b1, 0.0)
        return jax.nn.softmax(h @ w2.T + b2, axis=-1)

    # bf16 weights/activations + approx reciprocal => loosened tolerances.
    ATOL = 2e-2

    # Single-state path (the per-env-step REINFORCE call; softmax over dim=0).
    x = jax.random.normal(kx, (in_shape,), jnp.float32)
    probs = jax.block_until_ready(policy_forward(x, packed))
    assert probs.shape == (out_shape,)
    assert jnp.allclose(probs, ref_forward(x[None, :])[0], atol=ATOL, rtol=ATOL)
    assert jnp.allclose(jnp.sum(probs), 1.0, atol=1e-2)

    # Small batched path (fits a single grid step).
    xb = jax.random.normal(kb, (5, in_shape), jnp.float32)
    probs_b = jax.block_until_ready(policy_forward(xb, packed))
    assert probs_b.shape == (5, out_shape)
    assert jnp.allclose(probs_b, ref_forward(xb), atol=ATOL, rtol=ATOL)
    assert jnp.allclose(jnp.sum(probs_b, axis=-1), 1.0, atol=1e-2)

    # Large rollout path (exercises the multi-tile batch grid).
    xr = jax.random.normal(kr, (2500, in_shape), jnp.float32)
    probs_r = jax.block_until_ready(policy_forward(xr, packed))
    assert probs_r.shape == (2500, out_shape)
    assert jnp.allclose(probs_r, ref_forward(xr), atol=ATOL, rtol=ATOL)
    assert jnp.allclose(jnp.sum(probs_r, axis=-1), 1.0, atol=1e-2)

    # Lane-dense (untrimmed) output path for a downstream fused sampler.
    probs_full = jax.block_until_ready(policy_forward(xb, packed, trim=False))
    assert probs_full.shape == (5, LANE_PAD)
    assert jnp.allclose(probs_full[:, :out_shape], ref_forward(xb),
                        atol=ATOL, rtol=ATOL)

    print("KERNEL_OK")
</pallas_src>

<mosaic_0001>
module attributes {stable_mosaic.version = 11 : i64} {
  func.func @_policy_kernel(%arg0: i32, %arg1: memref<8x8xbf16, #tpu.memory_space<vmem>>, %arg2: memref<144x128xbf16, #tpu.memory_space<vmem>>, %arg3: memref<8x128xf32, #tpu.memory_space<vmem>>) attributes {dimension_semantics = [#tpu.dimension_semantics<parallel>], iteration_bounds = array<i64: 1>, scalar_prefetch = 0 : i64, scratch_operands = 0 : i64, tpu.core_type = #tpu.core_type<tc>, window_params = [{transform_indices = @transform_0, window_bounds = array<i64: 8, 8>}, {pipeline_mode = #tpu.pipeline_mode<synchronous>, transform_indices = @transform_1, window_bounds = array<i64: 144, 128>}, {transform_indices = @transform_2, window_bounds = array<i64: 8, 128>}]} {
    %c0 = arith.constant 0 : index
    %c0_0 = arith.constant 0 : index
    %0 = vector.load %arg2[%c0, %c0_0] : memref<144x128xbf16, #tpu.memory_space<vmem>>, vector<8x128xbf16>
    %c8 = arith.constant 8 : index
    %c0_1 = arith.constant 0 : index
    %1 = vector.load %arg2[%c8, %c0_1] : memref<144x128xbf16, #tpu.memory_space<vmem>>, vector<128x128xbf16>
    %c136 = arith.constant 136 : index
    %c0_2 = arith.constant 0 : index
    %2 = vector.load %arg2[%c136, %c0_2] : memref<144x128xbf16, #tpu.memory_space<vmem>>, vector<8x128xbf16>
    %3 = arith.extf %2 : vector<8x128xbf16> to vector<8x128xf32>
    %4 = vector.extract_strided_slice %3 {offsets = [0, 0], sizes = [1, 128], strides = [1, 1]} : vector<8x128xf32> to vector<1x128xf32>
    %5 = vector.extract_strided_slice %3 {offsets = [1, 0], sizes = [1, 128], strides = [1, 1]} : vector<8x128xf32> to vector<1x128xf32>
    %c0_3 = arith.constant 0 : index
    %c0_4 = arith.constant 0 : index
    %6 = vector.load %arg1[%c0_3, %c0_4] : memref<8x8xbf16, #tpu.memory_space<vmem>>, vector<8x8xbf16>
    %cst = arith.constant dense<0.000000e+00> : vector<8x128xf32>
    %7 = tpu.matmul %6, %0, %cst {dimension_numbers = #tpu.dot_dimension_numbers<[1], [0], [0], [1], [0, 0, 1, 1], [], []>} : vector<8x8xbf16>, vector<8x128xbf16>, vector<8x128xf32> -> vector<8x128xf32>
    %8 = vector.broadcast %4 : vector<1x128xf32> to vector<8x128xf32>
    %9 = arith.addf %7, %8 : vector<8x128xf32>
    %cst_5 = arith.constant 0.000000e+00 : f32
    %10 = vector.broadcast %cst_5 : f32 to vector<8x128xf32>
    %11 = arith.maximumf %9, %10 : vector<8x128xf32>
    %12 = arith.truncf %11 : vector<8x128xf32> to vector<8x128xbf16>
    %cst_6 = arith.constant dense<0.000000e+00> : vector<8x128xf32>
    %13 = tpu.matmul %12, %1, %cst_6 {dimension_numbers = #tpu.dot_dimension_numbers<[1], [0], [0], [1], [0, 0, 1, 1], [], []>} : vector<8x128xbf16>, vector<128x128xbf16>, vector<8x128xf32> -> vector<8x128xf32>
    %14 = vector.broadcast %5 : vector<1x128xf32> to vector<8x128xf32>
    %15 = arith.addf %13, %14 : vector<8x128xf32>
    %16 = tpu.iota {dimensions = array<i32: 1>} : vector<8x128xi32>
    %c2_i32 = arith.constant 2 : i32
    %17 = vector.broadcast %c2_i32 : i32 to vector<8x128xi32>
    %18 = arith.cmpi slt, %16, %17 : vector<8x128xi32>
    %cst_7 = arith.constant -1.000000e+30 : f32
    %19 = vector.broadcast %cst_7 : f32 to vector<8x128xf32>
    %20 = arith.select %18, %15, %19 : vector<8x128xi1>, vector<8x128xf32>
    %cst_8 = arith.constant dense<0xFF800000> : vector<8xf32>
    %21 = vector.multi_reduction <maximumf>, %20, %cst_8 [1] : vector<8x128xf32> to vector<8xf32>
    %22 = vector.shape_cast %21 : vector<8xf32> to vector<8x1xf32>
    %23 = vector.broadcast %22 : vector<8x1xf32> to vector<8x128xf32>
    %24 = arith.subf %20, %23 : vector<8x128xf32>
    %25 = math.exp %24 : vector<8x128xf32>
    %cst_9 = arith.constant dense<0.000000e+00> : vector<8xf32>
    %26 = vector.multi_reduction <add>, %25, %cst_9 [1] : vector<8x128xf32> to vector<8xf32>
    %27 = vector.shape_cast %26 : vector<8xf32> to vector<8x1xf32>
    %28 = tpu.reciprocal %27 {approx = true} : vector<8x1xf32> -> vector<8x1xf32>
    %29 = vector.broadcast %28 : vector<8x1xf32> to vector<8x128xf32>
    %30 = arith.mulf %25, %29 : vector<8x128xf32>
    %c0_10 = arith.constant 0 : index
    %c0_11 = arith.constant 0 : index
    %31 = vector.load %arg3[%c0_10, %c0_11] : memref<8x128xf32, #tpu.memory_space<vmem>>, vector<8x128xf32>
    tpu.vector_store %arg3[%c0_10, %c0_11], %30 {strides = array<i32>} : memref<8x128xf32, #tpu.memory_space<vmem>>, vector<8x128xf32>,
    return
  }
  func.func @transform_0(%arg0: i32) -> (i32, i32) {
    %c0_i32 = arith.constant 0 : i32
    %c0_i32_0 = arith.constant 0 : i32
    return %arg0, %c0_i32 : i32, i32
  }
  func.func @transform_1(%arg0: i32) -> (i32, i32) {
    %c0_i32 = arith.constant 0 : i32
    %c0_i32_0 = arith.constant 0 : i32
    %c0_i32_1 = arith.constant 0 : i32
    return %c0_i32, %c0_i32_0 : i32, i32
  }
  func.func @transform_2(%arg0: i32) -> (i32, i32) {
    %c0_i32 = arith.constant 0 : i32
    %c0_i32_0 = arith.constant 0 : i32
    return %arg0, %c0_i32 : i32, i32
  }
}

</mosaic_0001>

<bundles_post_ra>
// kernel: _policy_forward_packed.1
= control target key start
LH: loop header
LB: loop body
LE: loop exit
PB: predicated region body
PF: predicated region fallthrough
CT: control target
= control target key end

     0   :  { %7 = vsyncpa [#allocation3], 0  ;;  %s298_s9 = smov [#allocation2]   ;;  %s336_s0 = inlined_call_operand.vmem [shape: bf16[8,8], index: 0, kind: input, shape index: {}]   ;;  %s337_s1 = inlined_call_operand.hbm [shape: bf16[144,128], index: 1, kind: input, shape index: {}]   ;;  %s338_s2 = inlined_call_operand.vmem [shape: f32[8,128], index: 2, kind: output, shape index: {}]  }
   0x1   :  { %s15_s10 = sshll.u32 %s298_s9, 4  ;;  %s274_s13 = scalar_lea.hbm %s337_s1, 1152  ;;  %s16_s10 = int_to_ptr.vmem [resolvable:$true] %s15_s10 }
   0x2   :  { %p275_p0 = scmp.ne.s32.totalorder %s337_s1, %s274_s13  ;;  %p278_p1 = scmp.lt.u32.totalorder %s274_s13, %s337_s1 }
   0x4   :  { %p280_p2 = pnand %p278_p1, %p275_p0 }
   0x6   :  { %283 = shalt.err (!%p280_p2)
}
   0x7   :  { %s284_s18 = scalar_lea.vmem %s16_s10, 1152  ;;  %p289_p4 = scmp.lt.s32.totalorder %s16_s10, %s16_s10 }
   0x8   :  { %p285_p3 = scmp.ne.s32.totalorder %s16_s10, %s284_s18  ;;  %p290_p5 = scmp.lt.s32.totalorder %s284_s18, %s284_s18 }
   0xa   :  { %p291_p6 = por %p290_p5, %p289_p4 }
   0xc   :  { %p292_p7 = pnand %p291_p6, %p285_p3 }
   0xe   :  { %295 = shalt.err (!%p292_p7)
}
   0xf   :  { %s299_s19 = smov 64   ;;  %s300_s20 = smov 4  }
  0x10   :  { %21 = dma.hbm_to_vmem [thread:$0]  %s337_s1, 1152, %s16_s10, [#allocation3], %s299_s19, %s299_s19, %s300_s20  }
  0x11   :  { %296 = dma.done.wait [#allocation3], 1152  }
  0x12   :  { %297 = vsyncadd [#allocation3], 4294966144  ;;  %v301_v0 = vmov 0.0   ;;  %vm302_vm0 = vmmov 0   ;;  %vm54_vm1 = vcmask 1043456   ;;  %vm50_vm2 = vcmask 64512  }
  0x13   :  { %231 = vmatprep.subr.bf16.mxu0 %v301_v0  ;;  %233 = vmatprep.mubr.msk.bf16.mxu0 %vm302_vm0, %v301_v0  ;;  %v26_v1 = vld [vmem:[#allocation2] sm:$0xf]  ;;  %v262_v3 = vld [vmem:[#allocation2 + $0x4] sm:$0xff]   ;;  %v263_v5 = vld [vmem:[#allocation2 + $0xc] sm:$0xff]   ;;  %v46_v12 = vlaneseq }
  0x14   :  { %237 = vmatprep.subr.bf16.mxu1 %v301_v0  ;;  %253 = vmatprep.mubr.msk.bf16.mxu1 %vm302_vm0, %v301_v0  ;;  %v56_v2 = vsel %vm54_vm1, %v26_v1, 0  ;;  %v45_v4 = vld [vmem:[%s336_s0] sm:$0xf]  ;;  %v264_v6 = vld [vmem:[#allocation2 + $0x14] sm:$0xff]   ;;  %v266_v8 = vld [vmem:[#allocation2 + $0x24] sm:$0xff]  }
  0x15   :  { %232 = vmatpush3.bf16.msra.mxu0 %v56_v2  ;;  %238 = vmatpush3.bf16.msra.mxu1 %v262_v3  ;;  %v265_v7 = vld [vmem:[#allocation2 + $0x1c] sm:$0xff]   ;;  %v267_v9 = vld [vmem:[#allocation2 + $0x2c] sm:$0xff]   ;;  %v268_v10 = vld [vmem:[#allocation2 + $0x34] sm:$0xff]   ;;  %v47_v13 = vshrl.u32 %v46_v12, 7  ;;  %v193_v26 = vand.u32 127, %v46_v12 }
  0x16   :  { %239 = vmatprep.subr.bf16.mxu1 %v301_v0  ;;  %v269_v11 = vld [vmem:[#allocation2 + $0x3c] sm:$0xff]   ;;  %v43_v14 = vld [vmem:[#allocation2 + $0x44] sm:$0xf] }
  0x17   :  { %v44_v15 = vunpack.c.l.bf16 %v43_v14  ;;  %v48_v16 = vsub.s32 0, %v47_v13  ;;  %v102_v25 = vsub.s32 1, %v47_v13  ;;  %vm194_vm3 = vcmp.lt.s32.totalorder %v193_v26, 2 }
  0x18   :  { %234 = vmatmul.mubr.msk.bf16.vlgmr.msra.gmra.mrb[0].mxu0 %vm50_vm2, %v45_v4 }
  0x19   :  { %240 = vmatpush3.bf16.msra.mxu1 %v263_v5  ;;  %v49_v17 = vrot.slane %v44_v15, %v48_v16  ;;  %v103_v27 = vrot.slane %v44_v15, %v102_v25 }
  0x1a   :  { %241 = vmatprep.subr.bf16.mxu1 %v301_v0 }
  0x1d   :  { %242 = vmatpush3.bf16.msra.mxu1 %v264_v6 }
  0x1e   :  { %243 = vmatprep.subr.bf16.mxu1 %v301_v0 }
  0x21   :  { %244 = vmatpush3.bf16.msra.mxu1 %v265_v7 }
  0x22   :  { %245 = vmatprep.subr.bf16.mxu1 %v301_v0 }
  0x25   :  { %246 = vmatpush3.bf16.msra.mxu1 %v266_v8 }
  0x26   :  { %247 = vmatprep.subr.bf16.mxu1 %v301_v0 }
  0x29   :  { %248 = vmatpush3.bf16.msra.mxu1 %v267_v9 }
  0x2a   :  { %249 = vmatprep.subr.bf16.mxu1 %v301_v0 }
  0x2d   :  { %250 = vmatpush3.bf16.msra.mxu1 %v268_v10 }
  0x2e   :  { %251 = vmatprep.subr.bf16.mxu1 %v301_v0 }
  0x31   :  { %252 = vmatpush3.bf16.msra.mxu1 %v269_v11 }
  0xeb   :  { %v92_v18 = vpop.f32.mrb[0].mxu0 }
  0xec   :  { %v93_v19 = vadd.f32 %v92_v18, %v49_v17  ;;  %v235_v20 = vpop.f32.mrb[1].mxu0 }
  0xed   :  { %v95_v21 = vpop.f32.mrb[2].mxu0 }
  0xee   :  { %v98_v22 = vmax.f32 %v93_v19, 0.0  ;;  %v236_v23 = vpop.f32.mrb[3].mxu0 }
  0xf0   :  { %v99_v24 = vpack.c.bf16 %v98_v22, %v98_v22 }
  0xf2   :  { %254 = vmatmul.mubr.bf16.vlgmr.msra.gmra.mrb[0].mxu1 %v99_v24 }
 0x1c5   :  { %v186_v28 = vpop.f32.mrb[0].mxu1 }
 0x1c6   :  { %v187_v29 = vadd.f32 %v186_v28, %v103_v27  ;;  %v255_v30 = vpop.f32.mrb[1].mxu1 }
 0x1c7   :  { %v189_v31 = vpop.f32.mrb[2].mxu1 }
 0x1c8   :  { %v256_v32 = vpop.f32.mrb[3].mxu1  ;;  %v195_v33 = vsel %vm194_vm3, %v187_v29, -1e+30 }
 0x1c9   :  { %196 = vmax.xlane.f32.xlu0 %v195_v33 }
 0x256   :  { %v197_v34 = vpop.xlane.xlu0 %196 }
 0x257   :  { %v198_v35 = vsub.f32 %v195_v33, %v197_v34 }
 0x259   :  { %v199_v36 = vmul.f32 1.442695, %v198_v35 }
 0x25b   :  { %270 = vpow2.f32 %v199_v36 }
 0x265   :  { %v271_v37 = vpop.eup %270 }
 0x266   :  { %201 = vadd.xlane.f32.xlu0 %v271_v37 }
 0x2f3   :  { %v202_v38 = vpop.xlane.xlu0 %201 }
 0x2f4   :  { %272 = vrcp.f32 %v202_v38 }
 0x2fe   :  { %v273_v39 = vpop.eup %272 }
 0x2ff   :  { %v204_v40 = vmul.f32 %v273_v39, %v271_v37 }
 0x301   :  { %205 = vst [vmem:[%s338_s2] sm:$0xff] %v204_v40 }
 0x302   :  { %210 = vsyncpa [#allocation3], 1 }

</bundles_post_ra>
